<compile_context>
chip_gen: v7x
topology: tpu7x:2x2x1
jax: 0.10.0
libtpu: 0.0.40
codegen_flags: <defaults>
</compile_context>

<pallas_src>
import functools

import numpy as np

import jax
import jax.numpy as jnp
from jax.experimental import pallas as pl
from jax.experimental.pallas import tpu as pltpu

BN_EPS = 1e-5
VMEM_LIMIT_BYTES = 32 * 1024 * 1024   # safe scoped-VMEM ceiling across v5e / v6e / v7x


# ----------------------------- Pallas kernels -----------------------------

def depthwise_stats_kernel(x_ref, wdw_ref, bdw_ref, mask_ref,
                           out_ref, sum_ref, ssq_ref, *, W):
    """Depthwise 3x3 conv (stride 1, pad 1) on the flattened (C, H*W) layout, fused with
    per-channel BN-statistics accumulation.

    Halo handling: for tap offset (dh, dw) the source pixel of output position p is
    p + dh*W + dw whenever it is in-bounds; we fetch it with a circular lane rotation
    (pltpu.roll) and zero the out-of-bounds positions with a precomputed 0/1 mask, so the
    wrapped-around lanes never contribute.

    Grid: (C_tiles, N).  N is the innermost "arbitrary" axis: sum_ref / ssq_ref keep the
    same block index across it, so they stay resident in VMEM and act as accumulators.

    x_ref   : (1, Tc, HW) f32   input tile (lane axis = H*W, lane-dense)
    wdw_ref : (Tc, 9)     f32   wdw[c, kh*3+kw] == torch depthwise.weight[c, 0, kh, kw]
    bdw_ref : (Tc, 1)     f32
    mask_ref: (9, HW)     f32   per-tap border-validity masks (1.0 inside, 0.0 outside)
    out_ref : (1, Tc, HW) f32   depthwise output (+bias)
    sum_ref : (Tc, 1)     f32   running per-channel sum over (N, H, W)
    ssq_ref : (Tc, 1)     f32   running per-channel sum of squares over (N, H, W)
    """
    n_idx = pl.program_id(1)

    x = x_ref[0]                         # (Tc, HW)
    wdw = wdw_ref[...]                   # (Tc, 9)
    masks = mask_ref[...]                # (9, HW)
    hw = x.shape[-1]

    # 9-tap accumulation: XLU lane rolls + VPU FMAs ride in the slack of this HBM-bandwidth
    # bound kernel.  Masks zero every lane whose (circularly) rolled source is out of the
    # 3x3 receptive field, so the circular wrap never leaks data.
    acc = jnp.zeros(x.shape, jnp.float32)
    for kh in range(3):
        for kw in range(3):
            k = kh * 3 + kw
            off = (kh - 1) * W + (kw - 1)        # flattened source offset of this tap
            shifted = x if off == 0 else pltpu.roll(x, shift=(-off) % hw, axis=1)
            acc = acc + (shifted * masks[k:k + 1, :]) * wdw[:, k:k + 1]
    y = acc + bdw_ref[...]                       # (Tc, HW)
    out_ref[0] = y

    # Fused BN statistics (biased variance finalized in kernel B as E[x^2] - E[x]^2).
    @pl.when(n_idx == 0)
    def _init():
        sum_ref[...] = jnp.zeros_like(sum_ref)
        ssq_ref[...] = jnp.zeros_like(ssq_ref)

    sum_ref[...] += jnp.sum(y, axis=1, keepdims=True)        # (Tc, 1)
    ssq_ref[...] += jnp.sum(y * y, axis=1, keepdims=True)    # (Tc, 1)


def bn_relu_pointwise_kernel(x_ref, sum_ref, ssq_ref, gamma_ref, beta_ref,
                             wpw_ref, bpw_ref, out_ref, *, inv_m, matmul_dtype):
    """BN finalize (mean/var -> scale/shift, O(Cin) work) + folded BN + ReLU + pointwise
    1x1 conv as an MXU matmul.  Lane axis is H*W -> lane-dense loads/stores and a
    lane-dense matmul output.

    x_ref    : (1, Cin, Thw)  f32   depthwise output tile
    sum_ref  : (Cin, 1)       f32   per-channel sum over (N, H, W)
    ssq_ref  : (Cin, 1)       f32   per-channel sum of squares over (N, H, W)
    gamma_ref: (Cin, 1)       f32
    beta_ref : (Cin, 1)       f32
    wpw_ref  : (Cout, Cin)    f32   wpw[o, c] == torch pointwise.weight[o, c, 0, 0]
    bpw_ref  : (Cout, 1)      f32
    out_ref  : (1, Cout, Thw) f32
    """
    # Per-channel BN finalization (tiny; EUP rsqrt + a few VPU ops per tile).
    mean = sum_ref[...] * inv_m                               # (Cin, 1)
    var = ssq_ref[...] * inv_m - mean * mean                  # biased var (torch training)
    scale = gamma_ref[...] * jax.lax.rsqrt(var + BN_EPS)
    shift = beta_ref[...] - mean * scale

    # Elementwise BN + ReLU kept in f32 (v5e VPU has no bf16); only MXU operands get cast.
    xr = jnp.maximum(x_ref[0] * scale + shift, 0.0)           # (Cin, Thw)
    y = jnp.dot(wpw_ref[...].astype(matmul_dtype), xr.astype(matmul_dtype),
                preferred_element_type=jnp.float32)           # (Cout, Thw)
    out_ref[0] = y + bpw_ref[...]


# ------------------------------- wrapper -----------------------------------

def _pick_tile(dim, candidates):
    for t in candidates:
        if dim % t == 0:
            return t
    return dim  # full extent (always a legal block size)


def _tap_masks(h, w):
    """0/1 validity mask per 3x3 tap over the flattened H*W axis (compile-time constant)."""
    row = np.repeat(np.arange(h), w)
    col = np.tile(np.arange(w), h)
    masks = []
    for kh in range(3):
        for kw in range(3):
            dh, dw = kh - 1, kw - 1
            ok = ((row + dh >= 0) & (row + dh < h) &
                  (col + dw >= 0) & (col + dw < w))
            masks.append(ok)
    return jnp.asarray(np.stack(masks).astype(np.float32))    # (9, h*w)


def separable_conv2d(x_nchw, params, *, matmul_dtype=jnp.float32):
    """Forward pass matching SeparableConv2d.forward (kernel_size=3, stride=1, dilation=1)."""
    wdw, bdw, gamma, beta, wpw, bpw = params
    n, c, h, w = x_nchw.shape
    cout = wpw.shape[1]
    hw = h * w

    # Contiguous NCHW -> (N, C, H*W) is a free view in XLA; everything stays in this layout.
    x2 = x_nchw.astype(jnp.float32).reshape(n, c, hw)

    # Per-channel params with C on the sublane (second-to-last) axis.
    wdw_c = wdw.reshape(9, c).T           # (C, 9)
    bdw_c = bdw.reshape(c, 1)
    tap_mask = _tap_masks(h, w)           # (9, HW) compile-time constant

    # ---- kernel A: depthwise conv (roll + mask halo) + fused BN statistics --------------
    tc = c if c <= 128 else (128 if c % 128 == 0 else c)   # channel tile: no halo needed
    dw_out, ch_sum, ch_ssq = pl.pallas_call(
        functools.partial(depthwise_stats_kernel, W=w),
        out_shape=(
            jax.ShapeDtypeStruct((n, c, hw), jnp.float32),
            jax.ShapeDtypeStruct((c, 1), jnp.float32),
            jax.ShapeDtypeStruct((c, 1), jnp.float32),
        ),
        grid_spec=pltpu.PrefetchScalarGridSpec(
            num_scalar_prefetch=0,
            grid=(c // tc, n),
            in_specs=[
                pl.BlockSpec((1, tc, hw), lambda ci, ni: (ni, ci, 0)),
                pl.BlockSpec((tc, 9), lambda ci, ni: (ci, 0)),
                pl.BlockSpec((tc, 1), lambda ci, ni: (ci, 0)),
                pl.BlockSpec((9, hw), lambda ci, ni: (0, 0)),
            ],
            out_specs=(
                pl.BlockSpec((1, tc, hw), lambda ci, ni: (ni, ci, 0)),
                # same block index across N (last grid axis) => resident accumulator
                pl.BlockSpec((tc, 1), lambda ci, ni: (ci, 0)),
                pl.BlockSpec((tc, 1), lambda ci, ni: (ci, 0)),
            ),
        ),
        compiler_params=pltpu.CompilerParams(
            dimension_semantics=("parallel", "arbitrary"),
            vmem_limit_bytes=VMEM_LIMIT_BYTES,
        ),
    )(x2, wdw_c, bdw_c, tap_mask)

    # ---- kernel B: BN finalize + fold + ReLU + pointwise matmul, streamed over (N, HW) --
    t_hw = _pick_tile(hw, (2048, 1024, 512, 256, 128))
    inv_m = 1.0 / float(n * hw)
    y2 = pl.pallas_call(
        functools.partial(bn_relu_pointwise_kernel, inv_m=inv_m,
                          matmul_dtype=matmul_dtype),
        out_shape=jax.ShapeDtypeStruct((n, cout, hw), jnp.float32),
        grid_spec=pltpu.PrefetchScalarGridSpec(
            num_scalar_prefetch=0,
            grid=(n, hw // t_hw),
            in_specs=[
                pl.BlockSpec((1, c, t_hw), lambda ni, mi: (ni, 0, mi)),
                pl.BlockSpec((c, 1), lambda ni, mi: (0, 0)),
                pl.BlockSpec((c, 1), lambda ni, mi: (0, 0)),
                pl.BlockSpec((c, 1), lambda ni, mi: (0, 0)),
                pl.BlockSpec((c, 1), lambda ni, mi: (0, 0)),
                pl.BlockSpec((cout, c), lambda ni, mi: (0, 0)),
                pl.BlockSpec((cout, 1), lambda ni, mi: (0, 0)),
            ],
            out_specs=pl.BlockSpec((1, cout, t_hw), lambda ni, mi: (ni, 0, mi)),
        ),
        compiler_params=pltpu.CompilerParams(
            dimension_semantics=("parallel", "parallel"),
            vmem_limit_bytes=VMEM_LIMIT_BYTES,
        ),
    )(dw_out, ch_sum, ch_ssq, gamma.reshape(c, 1), beta.reshape(c, 1),
      wpw.T, bpw.reshape(cout, 1))

    return y2.reshape(n, cout, h, w)


# --------------------------- pure-JAX reference -----------------------------

def reference(x_nchw, wdw, bdw, gamma, beta, wpw, bpw):
    cin = x_nchw.shape[1]
    w_dw = jnp.transpose(wdw, (2, 0, 1))[:, None, :, :]                 # (Cin,1,3,3)
    y = jax.lax.conv_general_dilated(
        x_nchw, w_dw, window_strides=(1, 1), padding=((1, 1), (1, 1)),
        feature_group_count=cin, dimension_numbers=("NCHW", "OIHW", "NCHW"))
    y = y + bdw.reshape(1, cin, 1, 1)
    mean = jnp.mean(y, axis=(0, 2, 3), keepdims=True)
    var = jnp.mean((y - mean) ** 2, axis=(0, 2, 3), keepdims=True)
    y = (y - mean) * jax.lax.rsqrt(var + BN_EPS)
    y = y * gamma.reshape(1, cin, 1, 1) + beta.reshape(1, cin, 1, 1)
    y = jnp.maximum(y, 0.0)
    w_pw = jnp.transpose(wpw, (1, 0))[:, :, None, None]                 # (Cout,Cin,1,1)
    y = jax.lax.conv_general_dilated(
        y, w_pw, window_strides=(1, 1), padding=((0, 0), (0, 0)),
        dimension_numbers=("NCHW", "OIHW", "NCHW"))
    return y + bpw.reshape(1, -1, 1, 1)


# --------------------------------- main --------------------------------------

if __name__ == "__main__":
    N, Cin, Cout, H, W = 2, 4, 8, 16, 16

    key = jax.random.PRNGKey(0)
    kx, k1, k2, k3, k4 = jax.random.split(key, 5)

    x = jax.random.normal(kx, (N, Cin, H, W), jnp.float32)

    # Deterministic parameter init (kaiming-uniform-like bounds; synthetic, not a checkpoint).
    bound_dw = 1.0 / 3.0                     # depthwise fan_in = 1*3*3
    wdw = jax.random.uniform(k1, (3, 3, Cin), jnp.float32, -bound_dw, bound_dw)
    bdw = jax.random.uniform(k2, (Cin,), jnp.float32, -bound_dw, bound_dw)
    bound_pw = 1.0 / (Cin ** 0.5)            # pointwise fan_in = Cin
    wpw = jax.random.uniform(k3, (Cin, Cout), jnp.float32, -bound_pw, bound_pw)
    bpw = jax.random.uniform(k4, (Cout,), jnp.float32, -bound_pw, bound_pw)
    gamma = jnp.ones((Cin,), jnp.float32)    # BatchNorm2d default affine init
    beta = jnp.zeros((Cin,), jnp.float32)

    params = (wdw, bdw, gamma, beta, wpw, bpw)
    ref = reference(x, *params)

    fwd = jax.jit(separable_conv2d, static_argnames=("matmul_dtype",))

    # Exact-semantics path (f32 MXU operands).
    out = jax.block_until_ready(fwd(x, params))
    assert out.shape == (N, Cout, H, W), out.shape
    assert jnp.allclose(out, ref, atol=2e-3, rtol=2e-3), float(jnp.max(jnp.abs(out - ref)))

    # v6e / v7x fast path: bf16 MXU operands (tolerance loosened accordingly).
    out_bf16 = jax.block_until_ready(fwd(x, params, matmul_dtype=jnp.bfloat16))
    assert jnp.allclose(out_bf16, ref, atol=1e-1, rtol=1e-1), \
        float(jnp.max(jnp.abs(out_bf16 - ref)))

    print("KERNEL_OK")
</pallas_src>

<mosaic_0001>
module attributes {stable_mosaic.version = 11 : i64} {
  func.func @bn_relu_pointwise_kernel(%arg0: i32, %arg1: i32, %arg2: memref<1x4x256xf32, #tpu.memory_space<vmem>>, %arg3: memref<4x1xf32, #tpu.memory_space<vmem>>, %arg4: memref<4x1xf32, #tpu.memory_space<vmem>>, %arg5: memref<4x1xf32, #tpu.memory_space<vmem>>, %arg6: memref<4x1xf32, #tpu.memory_space<vmem>>, %arg7: memref<8x4xf32, #tpu.memory_space<vmem>>, %arg8: memref<8x1xf32, #tpu.memory_space<vmem>>, %arg9: memref<1x8x256xf32, #tpu.memory_space<vmem>>) attributes {dimension_semantics = [#tpu.dimension_semantics<parallel>, #tpu.dimension_semantics<parallel>], iteration_bounds = array<i64: 2, 1>, scalar_prefetch = 0 : i64, scratch_operands = 0 : i64, tpu.core_type = #tpu.core_type<tc>, window_params = [{transform_indices = @transform_0, window_bounds = array<i64: 1, 4, 256>}, {pipeline_mode = #tpu.pipeline_mode<synchronous>, transform_indices = @transform_1, window_bounds = array<i64: 4, 1>}, {pipeline_mode = #tpu.pipeline_mode<synchronous>, transform_indices = @transform_2, window_bounds = array<i64: 4, 1>}, {pipeline_mode = #tpu.pipeline_mode<synchronous>, transform_indices = @transform_3, window_bounds = array<i64: 4, 1>}, {pipeline_mode = #tpu.pipeline_mode<synchronous>, transform_indices = @transform_4, window_bounds = array<i64: 4, 1>}, {pipeline_mode = #tpu.pipeline_mode<synchronous>, transform_indices = @transform_5, window_bounds = array<i64: 8, 4>}, {pipeline_mode = #tpu.pipeline_mode<synchronous>, transform_indices = @transform_6, window_bounds = array<i64: 8, 1>}, {transform_indices = @transform_7, window_bounds = array<i64: 1, 8, 256>}]} {
    %c0 = arith.constant 0 : index
    %c0_0 = arith.constant 0 : index
    %0 = vector.load %arg3[%c0, %c0_0] : memref<4x1xf32, #tpu.memory_space<vmem>>, vector<4x1xf32>
    %cst = arith.constant 0.001953125 : f32
    %1 = vector.broadcast %cst : f32 to vector<4x1xf32>
    %2 = arith.mulf %0, %1 : vector<4x1xf32>
    %c0_1 = arith.constant 0 : index
    %c0_2 = arith.constant 0 : index
    %3 = vector.load %arg4[%c0_1, %c0_2] : memref<4x1xf32, #tpu.memory_space<vmem>>, vector<4x1xf32>
    %cst_3 = arith.constant 0.001953125 : f32
    %4 = vector.broadcast %cst_3 : f32 to vector<4x1xf32>
    %5 = arith.mulf %3, %4 : vector<4x1xf32>
    %6 = arith.mulf %2, %2 : vector<4x1xf32>
    %7 = arith.subf %5, %6 : vector<4x1xf32>
    %c0_4 = arith.constant 0 : index
    %c0_5 = arith.constant 0 : index
    %8 = vector.load %arg5[%c0_4, %c0_5] : memref<4x1xf32, #tpu.memory_space<vmem>>, vector<4x1xf32>
    %cst_6 = arith.constant 9.99999974E-6 : f32
    %9 = vector.broadcast %cst_6 : f32 to vector<4x1xf32>
    %10 = arith.addf %7, %9 : vector<4x1xf32>
    %11 = math.rsqrt %10 : vector<4x1xf32>
    %12 = arith.mulf %8, %11 : vector<4x1xf32>
    %c0_7 = arith.constant 0 : index
    %c0_8 = arith.constant 0 : index
    %13 = vector.load %arg6[%c0_7, %c0_8] : memref<4x1xf32, #tpu.memory_space<vmem>>, vector<4x1xf32>
    %14 = arith.mulf %2, %12 : vector<4x1xf32>
    %15 = arith.subf %13, %14 : vector<4x1xf32>
    %c0_9 = arith.constant 0 : index
    %c0_10 = arith.constant 0 : index
    %c0_11 = arith.constant 0 : index
    %16 = vector.load %arg2[%c0_9, %c0_10, %c0_11] : memref<1x4x256xf32, #tpu.memory_space<vmem>>, vector<1x4x256xf32>
    %17 = vector.shape_cast %16 : vector<1x4x256xf32> to vector<4x256xf32>
    %18 = vector.broadcast %12 : vector<4x1xf32> to vector<4x256xf32>
    %19 = arith.mulf %17, %18 : vector<4x256xf32>
    %20 = vector.broadcast %15 : vector<4x1xf32> to vector<4x256xf32>
    %21 = arith.addf %19, %20 : vector<4x256xf32>
    %cst_12 = arith.constant 0.000000e+00 : f32
    %22 = vector.broadcast %cst_12 : f32 to vector<4x256xf32>
    %23 = arith.maximumf %21, %22 : vector<4x256xf32>
    %c0_13 = arith.constant 0 : index
    %c0_14 = arith.constant 0 : index
    %24 = vector.load %arg7[%c0_13, %c0_14] : memref<8x4xf32, #tpu.memory_space<vmem>>, vector<8x4xf32>
    %cst_15 = arith.constant dense<0.000000e+00> : vector<8x256xf32>
    %25 = tpu.matmul %24, %23, %cst_15 {dimension_numbers = #tpu.dot_dimension_numbers<[1], [0], [0], [1], [0, 0, 1, 1], [], []>} : vector<8x4xf32>, vector<4x256xf32>, vector<8x256xf32> -> vector<8x256xf32>
    %c0_16 = arith.constant 0 : index
    %c0_17 = arith.constant 0 : index
    %26 = vector.load %arg8[%c0_16, %c0_17] : memref<8x1xf32, #tpu.memory_space<vmem>>, vector<8x1xf32>
    %27 = vector.broadcast %26 : vector<8x1xf32> to vector<8x256xf32>
    %28 = arith.addf %25, %27 : vector<8x256xf32>
    %c0_18 = arith.constant 0 : index
    %c0_19 = arith.constant 0 : index
    %c0_20 = arith.constant 0 : index
    %29 = vector.load %arg9[%c0_18, %c0_19, %c0_20] : memref<1x8x256xf32, #tpu.memory_space<vmem>>, vector<1x8x256xf32>
    %30 = vector.shape_cast %29 : vector<1x8x256xf32> to vector<8x256xf32>
    %31 = vector.shape_cast %28 : vector<8x256xf32> to vector<1x8x256xf32>
    tpu.vector_store %arg9[%c0_18, %c0_19, %c0_20], %31 {strides = array<i32>} : memref<1x8x256xf32, #tpu.memory_space<vmem>>, vector<1x8x256xf32>,
    return
  }
  func.func @transform_0(%arg0: i32, %arg1: i32) -> (i32, i32, i32) {
    %c0_i32 = arith.constant 0 : i32
    %c0_i32_0 = arith.constant 0 : i32
    return %arg0, %c0_i32, %arg1 : i32, i32, i32
  }
  func.func @transform_1(%arg0: i32, %arg1: i32) -> (i32, i32) {
    %c0_i32 = arith.constant 0 : i32
    %c0_i32_0 = arith.constant 0 : i32
    %c0_i32_1 = arith.constant 0 : i32
    return %c0_i32, %c0_i32_0 : i32, i32
  }
  func.func @transform_2(%arg0: i32, %arg1: i32) -> (i32, i32) {
    %c0_i32 = arith.constant 0 : i32
    %c0_i32_0 = arith.constant 0 : i32
    %c0_i32_1 = arith.constant 0 : i32
    return %c0_i32, %c0_i32_0 : i32, i32
  }
  func.func @transform_3(%arg0: i32, %arg1: i32) -> (i32, i32) {
    %c0_i32 = arith.constant 0 : i32
    %c0_i32_0 = arith.constant 0 : i32
    %c0_i32_1 = arith.constant 0 : i32
    return %c0_i32, %c0_i32_0 : i32, i32
  }
  func.func @transform_4(%arg0: i32, %arg1: i32) -> (i32, i32) {
    %c0_i32 = arith.constant 0 : i32
    %c0_i32_0 = arith.constant 0 : i32
    %c0_i32_1 = arith.constant 0 : i32
    return %c0_i32, %c0_i32_0 : i32, i32
  }
  func.func @transform_5(%arg0: i32, %arg1: i32) -> (i32, i32) {
    %c0_i32 = arith.constant 0 : i32
    %c0_i32_0 = arith.constant 0 : i32
    %c0_i32_1 = arith.constant 0 : i32
    return %c0_i32, %c0_i32_0 : i32, i32
  }
  func.func @transform_6(%arg0: i32, %arg1: i32) -> (i32, i32) {
    %c0_i32 = arith.constant 0 : i32
    %c0_i32_0 = arith.constant 0 : i32
    %c0_i32_1 = arith.constant 0 : i32
    return %c0_i32, %c0_i32_0 : i32, i32
  }
  func.func @transform_7(%arg0: i32, %arg1: i32) -> (i32, i32, i32) {
    %c0_i32 = arith.constant 0 : i32
    %c0_i32_0 = arith.constant 0 : i32
    return %arg0, %c0_i32, %arg1 : i32, i32, i32
  }
}

module attributes {stable_mosaic.version = 11 : i64} {
  func.func @depthwise_stats_kernel(%arg0: i32, %arg1: i32, %arg2: memref<1x4x256xf32, #tpu.memory_space<vmem>>, %arg3: memref<4x9xf32, #tpu.memory_space<vmem>>, %arg4: memref<4x1xf32, #tpu.memory_space<vmem>>, %arg5: memref<9x256xf32, #tpu.memory_space<vmem>>, %arg6: memref<1x4x256xf32, #tpu.memory_space<vmem>>, %arg7: memref<4x1xf32, #tpu.memory_space<vmem>>, %arg8: memref<4x1xf32, #tpu.memory_space<vmem>>) attributes {dimension_semantics = [#tpu.dimension_semantics<parallel>, #tpu.dimension_semantics<arbitrary>], iteration_bounds = array<i64: 1, 2>, scalar_prefetch = 0 : i64, scratch_operands = 0 : i64, tpu.core_type = #tpu.core_type<tc>, window_params = [{transform_indices = @transform_0, window_bounds = array<i64: 1, 4, 256>}, {transform_indices = @transform_1, window_bounds = array<i64: 4, 9>}, {transform_indices = @transform_2, window_bounds = array<i64: 4, 1>}, {pipeline_mode = #tpu.pipeline_mode<synchronous>, transform_indices = @transform_3, window_bounds = array<i64: 9, 256>}, {transform_indices = @transform_4, window_bounds = array<i64: 1, 4, 256>}, {transform_indices = @transform_5, window_bounds = array<i64: 4, 1>}, {transform_indices = @transform_6, window_bounds = array<i64: 4, 1>}]} {
    %c0 = arith.constant 0 : index
    %c0_0 = arith.constant 0 : index
    %c0_1 = arith.constant 0 : index
    %0 = vector.load %arg2[%c0, %c0_0, %c0_1] : memref<1x4x256xf32, #tpu.memory_space<vmem>>, vector<1x4x256xf32>
    %1 = vector.shape_cast %0 : vector<1x4x256xf32> to vector<4x256xf32>
    %c0_2 = arith.constant 0 : index
    %c0_3 = arith.constant 0 : index
    %2 = vector.load %arg3[%c0_2, %c0_3] : memref<4x9xf32, #tpu.memory_space<vmem>>, vector<4x9xf32>
    %c0_4 = arith.constant 0 : index
    %c0_5 = arith.constant 0 : index
    %3 = vector.load %arg5[%c0_4, %c0_5] : memref<9x256xf32, #tpu.memory_space<vmem>>, vector<9x256xf32>
    %cst = arith.constant 0.000000e+00 : f32
    %4 = vector.broadcast %cst : f32 to vector<4x256xf32>
    %c17_i32 = arith.constant 17 : i32
    %5 = tpu.dynamic_rotate %1 by %c17_i32 dim 1 : vector<4x256xf32>, i32 -> vector<4x256xf32>
    %6 = vector.extract_strided_slice %3 {offsets = [0, 0], sizes = [1, 256], strides = [1, 1]} : vector<9x256xf32> to vector<1x256xf32>
    %7 = vector.broadcast %6 : vector<1x256xf32> to vector<4x256xf32>
    %8 = arith.mulf %5, %7 : vector<4x256xf32>
    %9 = vector.extract_strided_slice %2 {offsets = [0, 0], sizes = [4, 1], strides = [1, 1]} : vector<4x9xf32> to vector<4x1xf32>
    %10 = vector.broadcast %9 : vector<4x1xf32> to vector<4x256xf32>
    %11 = arith.mulf %8, %10 : vector<4x256xf32>
    %12 = arith.addf %4, %11 : vector<4x256xf32>
    %c16_i32 = arith.constant 16 : i32
    %13 = tpu.dynamic_rotate %1 by %c16_i32 dim 1 : vector<4x256xf32>, i32 -> vector<4x256xf32>
    %14 = vector.extract_strided_slice %3 {offsets = [1, 0], sizes = [1, 256], strides = [1, 1]} : vector<9x256xf32> to vector<1x256xf32>
    %15 = vector.broadcast %14 : vector<1x256xf32> to vector<4x256xf32>
    %16 = arith.mulf %13, %15 : vector<4x256xf32>
    %17 = vector.extract_strided_slice %2 {offsets = [0, 1], sizes = [4, 1], strides = [1, 1]} : vector<4x9xf32> to vector<4x1xf32>
    %18 = vector.broadcast %17 : vector<4x1xf32> to vector<4x256xf32>
    %19 = arith.mulf %16, %18 : vector<4x256xf32>
    %20 = arith.addf %12, %19 : vector<4x256xf32>
    %c15_i32 = arith.constant 15 : i32
    %21 = tpu.dynamic_rotate %1 by %c15_i32 dim 1 : vector<4x256xf32>, i32 -> vector<4x256xf32>
    %22 = vector.extract_strided_slice %3 {offsets = [2, 0], sizes = [1, 256], strides = [1, 1]} : vector<9x256xf32> to vector<1x256xf32>
    %23 = vector.broadcast %22 : vector<1x256xf32> to vector<4x256xf32>
    %24 = arith.mulf %21, %23 : vector<4x256xf32>
    %25 = vector.extract_strided_slice %2 {offsets = [0, 2], sizes = [4, 1], strides = [1, 1]} : vector<4x9xf32> to vector<4x1xf32>
    %26 = vector.broadcast %25 : vector<4x1xf32> to vector<4x256xf32>
    %27 = arith.mulf %24, %26 : vector<4x256xf32>
    %28 = arith.addf %20, %27 : vector<4x256xf32>
    %c1_i32 = arith.constant 1 : i32
    %29 = tpu.dynamic_rotate %1 by %c1_i32 dim 1 : vector<4x256xf32>, i32 -> vector<4x256xf32>
    %30 = vector.extract_strided_slice %3 {offsets = [3, 0], sizes = [1, 256], strides = [1, 1]} : vector<9x256xf32> to vector<1x256xf32>
    %31 = vector.broadcast %30 : vector<1x256xf32> to vector<4x256xf32>
    %32 = arith.mulf %29, %31 : vector<4x256xf32>
    %33 = vector.extract_strided_slice %2 {offsets = [0, 3], sizes = [4, 1], strides = [1, 1]} : vector<4x9xf32> to vector<4x1xf32>
    %34 = vector.broadcast %33 : vector<4x1xf32> to vector<4x256xf32>
    %35 = arith.mulf %32, %34 : vector<4x256xf32>
    %36 = arith.addf %28, %35 : vector<4x256xf32>
    %37 = vector.extract_strided_slice %3 {offsets = [4, 0], sizes = [1, 256], strides = [1, 1]} : vector<9x256xf32> to vector<1x256xf32>
    %38 = vector.broadcast %37 : vector<1x256xf32> to vector<4x256xf32>
    %39 = arith.mulf %1, %38 : vector<4x256xf32>
    %40 = vector.extract_strided_slice %2 {offsets = [0, 4], sizes = [4, 1], strides = [1, 1]} : vector<4x9xf32> to vector<4x1xf32>
    %41 = vector.broadcast %40 : vector<4x1xf32> to vector<4x256xf32>
    %42 = arith.mulf %39, %41 : vector<4x256xf32>
    %43 = arith.addf %36, %42 : vector<4x256xf32>
    %c255_i32 = arith.constant 255 : i32
    %44 = tpu.dynamic_rotate %1 by %c255_i32 dim 1 : vector<4x256xf32>, i32 -> vector<4x256xf32>
    %45 = vector.extract_strided_slice %3 {offsets = [5, 0], sizes = [1, 256], strides = [1, 1]} : vector<9x256xf32> to vector<1x256xf32>
    %46 = vector.broadcast %45 : vector<1x256xf32> to vector<4x256xf32>
    %47 = arith.mulf %44, %46 : vector<4x256xf32>
    %48 = vector.extract_strided_slice %2 {offsets = [0, 5], sizes = [4, 1], strides = [1, 1]} : vector<4x9xf32> to vector<4x1xf32>
    %49 = vector.broadcast %48 : vector<4x1xf32> to vector<4x256xf32>
    %50 = arith.mulf %47, %49 : vector<4x256xf32>
    %51 = arith.addf %43, %50 : vector<4x256xf32>
    %c241_i32 = arith.constant 241 : i32
    %52 = tpu.dynamic_rotate %1 by %c241_i32 dim 1 : vector<4x256xf32>, i32 -> vector<4x256xf32>
    %53 = vector.extract_strided_slice %3 {offsets = [6, 0], sizes = [1, 256], strides = [1, 1]} : vector<9x256xf32> to vector<1x256xf32>
    %54 = vector.broadcast %53 : vector<1x256xf32> to vector<4x256xf32>
    %55 = arith.mulf %52, %54 : vector<4x256xf32>
    %56 = vector.extract_strided_slice %2 {offsets = [0, 6], sizes = [4, 1], strides = [1, 1]} : vector<4x9xf32> to vector<4x1xf32>
    %57 = vector.broadcast %56 : vector<4x1xf32> to vector<4x256xf32>
    %58 = arith.mulf %55, %57 : vector<4x256xf32>
    %59 = arith.addf %51, %58 : vector<4x256xf32>
    %c240_i32 = arith.constant 240 : i32
    %60 = tpu.dynamic_rotate %1 by %c240_i32 dim 1 : vector<4x256xf32>, i32 -> vector<4x256xf32>
    %61 = vector.extract_strided_slice %3 {offsets = [7, 0], sizes = [1, 256], strides = [1, 1]} : vector<9x256xf32> to vector<1x256xf32>
    %62 = vector.broadcast %61 : vector<1x256xf32> to vector<4x256xf32>
    %63 = arith.mulf %60, %62 : vector<4x256xf32>
    %64 = vector.extract_strided_slice %2 {offsets = [0, 7], sizes = [4, 1], strides = [1, 1]} : vector<4x9xf32> to vector<4x1xf32>
    %65 = vector.broadcast %64 : vector<4x1xf32> to vector<4x256xf32>
    %66 = arith.mulf %63, %65 : vector<4x256xf32>
    %67 = arith.addf %59, %66 : vector<4x256xf32>
    %c239_i32 = arith.constant 239 : i32
    %68 = tpu.dynamic_rotate %1 by %c239_i32 dim 1 : vector<4x256xf32>, i32 -> vector<4x256xf32>
    %69 = vector.extract_strided_slice %3 {offsets = [8, 0], sizes = [1, 256], strides = [1, 1]} : vector<9x256xf32> to vector<1x256xf32>
    %70 = vector.broadcast %69 : vector<1x256xf32> to vector<4x256xf32>
    %71 = arith.mulf %68, %70 : vector<4x256xf32>
    %72 = vector.extract_strided_slice %2 {offsets = [0, 8], sizes = [4, 1], strides = [1, 1]} : vector<4x9xf32> to vector<4x1xf32>
    %73 = vector.broadcast %72 : vector<4x1xf32> to vector<4x256xf32>
    %74 = arith.mulf %71, %73 : vector<4x256xf32>
    %75 = arith.addf %67, %74 : vector<4x256xf32>
    %c0_6 = arith.constant 0 : index
    %c0_7 = arith.constant 0 : index
    %76 = vector.load %arg4[%c0_6, %c0_7] : memref<4x1xf32, #tpu.memory_space<vmem>>, vector<4x1xf32>
    %77 = vector.broadcast %76 : vector<4x1xf32> to vector<4x256xf32>
    %78 = arith.addf %75, %77 : vector<4x256xf32>
    %c0_8 = arith.constant 0 : index
    %c0_9 = arith.constant 0 : index
    %c0_10 = arith.constant 0 : index
    %79 = vector.load %arg6[%c0_8, %c0_9, %c0_10] : memref<1x4x256xf32, #tpu.memory_space<vmem>>, vector<1x4x256xf32>
    %80 = vector.shape_cast %79 : vector<1x4x256xf32> to vector<4x256xf32>
    %81 = vector.shape_cast %78 : vector<4x256xf32> to vector<1x4x256xf32>
    tpu.vector_store %arg6[%c0_8, %c0_9, %c0_10], %81 {strides = array<i32>} : memref<1x4x256xf32, #tpu.memory_space<vmem>>, vector<1x4x256xf32>,
    %c0_i32 = arith.constant 0 : i32
    %82 = arith.cmpi eq, %arg1, %c0_i32 : i32
    %83 = arith.extui %82 : i1 to i32
    %c0_i32_11 = arith.constant 0 : i32
    %84 = arith.cmpi ne, %83, %c0_i32_11 : i32
    scf.if %84 {
      %cst_22 = arith.constant 0.000000e+00 : f32
      %96 = vector.broadcast %cst_22 : f32 to vector<4x1xf32>
      %c0_23 = arith.constant 0 : index
      %c0_24 = arith.constant 0 : index
      %97 = vector.load %arg7[%c0_23, %c0_24] : memref<4x1xf32, #tpu.memory_space<vmem>>, vector<4x1xf32>
      tpu.vector_store %arg7[%c0_23, %c0_24], %96 {strides = array<i32>} : memref<4x1xf32, #tpu.memory_space<vmem>>, vector<4x1xf32>,
      %cst_25 = arith.constant 0.000000e+00 : f32
      %98 = vector.broadcast %cst_25 : f32 to vector<4x1xf32>
      %c0_26 = arith.constant 0 : index
      %c0_27 = arith.constant 0 : index
      %99 = vector.load %arg8[%c0_26, %c0_27] : memref<4x1xf32, #tpu.memory_space<vmem>>, vector<4x1xf32>
      tpu.vector_store %arg8[%c0_26, %c0_27], %98 {strides = array<i32>} : memref<4x1xf32, #tpu.memory_space<vmem>>, vector<4x1xf32>,
    } else {
    }
    %c0_12 = arith.constant 0 : index
    %c0_13 = arith.constant 0 : index
    %85 = vector.load %arg7[%c0_12, %c0_13] : memref<4x1xf32, #tpu.memory_space<vmem>>, vector<4x1xf32>
    %cst_14 = arith.constant dense<0.000000e+00> : vector<4xf32>
    %86 = vector.multi_reduction <add>, %78, %cst_14 [1] : vector<4x256xf32> to vector<4xf32>
    %87 = vector.shape_cast %86 : vector<4xf32> to vector<4x1xf32>
    %88 = arith.addf %85, %87 : vector<4x1xf32>
    %c0_15 = arith.constant 0 : index
    %c0_16 = arith.constant 0 : index
    %89 = vector.load %arg7[%c0_15, %c0_16] : memref<4x1xf32, #tpu.memory_space<vmem>>, vector<4x1xf32>
    tpu.vector_store %arg7[%c0_15, %c0_16], %88 {strides = array<i32>} : memref<4x1xf32, #tpu.memory_space<vmem>>, vector<4x1xf32>,
    %c0_17 = arith.constant 0 : index
    %c0_18 = arith.constant 0 : index
    %90 = vector.load %arg8[%c0_17, %c0_18] : memref<4x1xf32, #tpu.memory_space<vmem>>, vector<4x1xf32>
    %91 = arith.mulf %78, %78 : vector<4x256xf32>
    %cst_19 = arith.constant dense<0.000000e+00> : vector<4xf32>
    %92 = vector.multi_reduction <add>, %91, %cst_19 [1] : vector<4x256xf32> to vector<4xf32>
    %93 = vector.shape_cast %92 : vector<4xf32> to vector<4x1xf32>
    %94 = arith.addf %90, %93 : vector<4x1xf32>
    %c0_20 = arith.constant 0 : index
    %c0_21 = arith.constant 0 : index
    %95 = vector.load %arg8[%c0_20, %c0_21] : memref<4x1xf32, #tpu.memory_space<vmem>>, vector<4x1xf32>
    tpu.vector_store %arg8[%c0_20, %c0_21], %94 {strides = array<i32>} : memref<4x1xf32, #tpu.memory_space<vmem>>, vector<4x1xf32>,
    return
  }
  func.func @transform_0(%arg0: i32, %arg1: i32) -> (i32, i32, i32) {
    %c0_i32 = arith.constant 0 : i32
    %c0_i32_0 = arith.constant 0 : i32
    return %arg1, %arg0, %c0_i32 : i32, i32, i32
  }
  func.func @transform_1(%arg0: i32, %arg1: i32) -> (i32, i32) {
    %c0_i32 = arith.constant 0 : i32
    %c0_i32_0 = arith.constant 0 : i32
    return %arg0, %c0_i32 : i32, i32
  }
  func.func @transform_2(%arg0: i32, %arg1: i32) -> (i32, i32) {
    %c0_i32 = arith.constant 0 : i32
    %c0_i32_0 = arith.constant 0 : i32
    return %arg0, %c0_i32 : i32, i32
  }
  func.func @transform_3(%arg0: i32, %arg1: i32) -> (i32, i32) {
    %c0_i32 = arith.constant 0 : i32
    %c0_i32_0 = arith.constant 0 : i32
    %c0_i32_1 = arith.constant 0 : i32
    return %c0_i32, %c0_i32_0 : i32, i32
  }
  func.func @transform_4(%arg0: i32, %arg1: i32) -> (i32, i32, i32) {
    %c0_i32 = arith.constant 0 : i32
    %c0_i32_0 = arith.constant 0 : i32
    return %arg1, %arg0, %c0_i32 : i32, i32, i32
  }
  func.func @transform_5(%arg0: i32, %arg1: i32) -> (i32, i32) {
    %c0_i32 = arith.constant 0 : i32
    %c0_i32_0 = arith.constant 0 : i32
    return %arg0, %c0_i32 : i32, i32
  }
  func.func @transform_6(%arg0: i32, %arg1: i32) -> (i32, i32) {
    %c0_i32 = arith.constant 0 : i32
    %c0_i32_0 = arith.constant 0 : i32
    return %arg0, %c0_i32 : i32, i32
  }
}

</mosaic_0001>

<bundles_post_ra>
// kernel: separable_conv2d.3
= control target key start
LH: loop header
LB: loop body
LE: loop exit
PB: predicated region body
PF: predicated region fallthrough
CT: control target
= control target key end

     0   :  { %s651_s24 = smov 0   ;;  %s653_s25 = smov 0   ;;  %s706_s0 = inlined_call_operand.vmem [shape: f32[2,4,256], index: 0, kind: input, shape index: {}]   ;;  %s707_s1 = inlined_call_operand.vmem [shape: f32[4,1], index: 1, kind: input, shape index: {}]   ;;  %s708_s2 = inlined_call_operand.vmem [shape: f32[4,1], index: 2, kind: input, shape index: {}]   ;;  %s709_s3 = inlined_call_operand.vmem [shape: f32[4,1], index: 3, kind: input, shape index: {}]   ;;  %s710_s4 = inlined_call_operand.vmem [shape: f32[4,1], index: 4, kind: input, shape index: {}]   ;;  %s711_s5 = inlined_call_operand.vmem [shape: f32[8,4], index: 5, kind: input, shape index: {}]   ;;  %s712_s6 = inlined_call_operand.vmem [shape: f32[8,1], index: 6, kind: input, shape index: {}]   ;;  %s713_s7 = inlined_call_operand.vmem [shape: f32[2,8,256], index: 7, kind: output, shape index: {}]  }
   0x1   :  { %s655_s26 = smov 0  }
   0x2 LB: > { %s29_s27 = sadd.s32 1, %s602_s25  ;;  %p541_p0 = scmp.ge.s32.totalorder %s606_s26, 1  ;;  %s606_s26 = sphi %s655_s26, %s17_s26   ;;  %s602_s25 = sphi %s653_s25, %s715_s25   ;;  %s598_s24 = sphi %s651_s24, %s714_s24  }
   0x3   : > { %p31_p1 = scmp.ge.s32.totalorder %s29_s27, 2  ;;  %p258_p2 = scmp.lt.s32.totalorder %s606_s26, 3 }
   0x5   : > { %s717_s27 = smov (%p31_p1, %s29_s27), 0  ;;  %p259_p3 = pnand %p541_p0, %p258_p2 }
   0x6   : > { %v318_v0 = vld [vmem:[%s707_s1] sm:$0xf] (!%p259_p3)  ;;  %v608_v2 = vmov (!%p259_p3), 0   ;;  %v609_v14 = vmov (!%p259_p3), 0.0   ;;  %p299_p4 = scmp.lt.s32.totalorder (!%p259_p3), %s598_s24, 1  ;;  %v339_v18 = vlaneseq (!%p259_p3)  ;;  %vm372_vm0 = vcmask (!%p259_p3), 1043456  }
   0x7   : > { %262 = sbr.rel (%p259_p3) target bundleno = 386 (0x182), region = 48  ;;  %v320_v1 = vld [vmem:[%s708_s2] sm:$0xf] (!%p259_p3)  ;;  %580 = vset.pattern.permute.xlu0 (!%p259_p3), %v608_v2  ;;  %v319_v3 = vmul.f32 (!%p259_p3), 0.001953125, %v318_v0  ;;  %581 = vset.pattern.permute.xlu1 (!%p259_p3), %v608_v2  ;;  %v610_v16 = vmov (!%p259_p3), 839922192  }
   0x8   : > { %v321_v4 = vmul.f32 (!%p259_p3), 0.001953125, %v320_v1  ;;  %v324_v8 = vld [vmem:[%s709_s3] sm:$0xf] (!%p259_p3)  ;;  %441 = vmatprep.mubr.f32.mxu0 (!%p259_p3), %v609_v14  ;;  %v337_v17 = vunpack.c.l.s4 (!%p259_p3), %v610_v16  ;;  %v340_v20 = vshrl.u32 (!%p259_p3), %v339_v18, 7  ;;  %vm368_vm1 = vcmask (!%p259_p3), 31744  }
   0x9   : > { %v322_v5 = vmul.f32 (!%p259_p3), %v319_v3, %v319_v3  ;;  %v328_v11 = vld [vmem:[%s710_s4] sm:$0xf] (!%p259_p3) }
   0xa   : > { %v360_v15 = vld [vmem:[%s712_s6] sm:$0xff] (!%p259_p3)  ;;  %v338_v19 = vunpack.c.0.s8 (!%p259_p3), %v337_v17 }
   0xb   : > { %v323_v6 = vsub.f32 (!%p259_p3), %v321_v4, %v322_v5  ;;  %363 = vperm.xlu1 (!%p259_p3), %581, %v360_v15   ;;  %v359_v31 = vld [vmem:[%s711_s5] sm:$0xff] (!%p259_p3) }
   0xc   : > { %v341_v21 = vsub.s32 (!%p259_p3), %v338_v19, %v340_v20 }
   0xd   : > { %v325_v7 = vadd.f32 (!%p259_p3), 1e-05, %v323_v6 }
   0xe   : > { %s719_s24 = smov (!%p299_p4, %s598_s24), 1 }
   0xf   : > { %582 = vrsqrt.f32 %v325_v7  ;;  %s551_s15 = sshll.u32 %s719_s24, 3  ;;  %s552_s21 = sshll.u32 %s719_s24, 4 }
  0x10   : > { %s306_s18 = scalar_lea.vmem %s706_s0, %s551_s15  ;;  %s316_s28 = scalar_lea.vmem %s713_s7, %s552_s21 }
  0x11   : > { %v331_v24 = vld [vmem:[%s306_s18] sm:$0xff] }
  0x19   : > { %v583_v9 = vpop.eup %582 }
  0x1a   : > { %v327_v10 = vmul.f32 %v583_v9, %v324_v8 }
  0x1c   : > { %334 = vperm.xlu0 %580, %v327_v10   ;;  %v329_v12 = vmul.f32 %v327_v10, %v319_v3 }
  0x1e   : > { %v330_v13 = vsub.f32 %v328_v11, %v329_v12 }
  0x20   : > { %347 = vperm.xlu0 %580, %v330_v13  }
  0x8a   : > { %v364_v32 = vpop.permute.xlu1 %363 }
  0x9b   : > { %v335_v22 = vpop.permute.xlu0 %334 }
  0x9c   : > { %v342_v23 = vrot.slane %v335_v22, %v341_v21 }
  0x9e   : > { %v344_v26 = vmul.f32 %v342_v23, %v331_v24 }
  0x9f   : > { %v348_v25 = vpop.permute.xlu0 %347 }
  0xa0   : > { %v355_v27 = vrot.slane %v348_v25, %v341_v21 }
  0xa2   : > { %v357_v28 = vadd.f32 %v355_v27, %v344_v26 }
  0xa4   : > { %v358_v29 = vmax.f32 %v357_v28, 0.0 }
  0xa6   : > { %v367_v30 = vcombine.high %v358_v29, %v358_v29 }
  0xa8   : > { %546 = vmatprep.subr.msk.mxu0 %vm372_vm0, %v367_v30 }
  0xa9   : > { %547 = vmatpush1.msk.msra.mxu0 %vm372_vm0, %v358_v29 }
  0xaa   : > { %548 = vmatmul.mubr.msk.f32.vlgmr.msra.gmra.mrb[0].mxu0 %vm368_vm1, %v359_v31 }
 0x17d   : > { %v443_v33 = vpop.f32.mrb[0].mxu0 }
 0x17e   : > { %v444_v34 = vadd.f32 %v443_v33, %v364_v32  ;;  %v445_v35 = vpop.f32.mrb[1].mxu0 }
 0x17f   : > { %v446_v36 = vadd.f32 %v445_v35, %v364_v32 }
 0x180   : > { %448 = vst [vmem:[%s316_s28] sm:$0xff] %v444_v34 }
 0x181   : > { %449 = vst [vmem:[%s316_s28 + $0x8] sm:$0xff] %v446_v36 }
 0x182 PF: > { %s17_s26 = sadd.s32 1, %s606_s26   ;;  %s714_s24 = smov %s602_s25 }
 0x183   : > { %p14_p5 = scmp.ge.s32.totalorder %s17_s26, 4   ;;  %s715_s25 = smov %s717_s27 }
 0x185   :  { %16 = sbr.rel (!%p14_p5) target bundleno = 2 (0x2), region = 78 }

// kernel: separable_conv2d.2
= control target key start
LH: loop header
LB: loop body
LE: loop exit
PB: predicated region body
PF: predicated region fallthrough
CT: control target
= control target key end

     0   :  { %s956_s21 = smov 0   ;;  %s958_s22 = smov 0   ;;  %s1122_s0 = inlined_call_operand.vmem [shape: f32[2,4,256], index: 0, kind: input, shape index: {}]   ;;  %s1123_s1 = inlined_call_operand.vmem [shape: f32[4,9], index: 1, kind: input, shape index: {}]   ;;  %s1124_s2 = inlined_call_operand.vmem [shape: f32[4,1], index: 2, kind: input, shape index: {}]   ;;  %s1125_s3 = inlined_call_operand.vmem [shape: f32[9,256], index: 3, kind: input, shape index: {}]   ;;  %s1126_s4 = inlined_call_operand.vmem [shape: f32[2,4,256], index: 4, kind: output, shape index: {0}]   ;;  %s1127_s5 = inlined_call_operand.vmem [shape: f32[4,1], index: 5, kind: output, shape index: {1}]   ;;  %s1128_s6 = inlined_call_operand.vmem [shape: f32[4,1], index: 6, kind: output, shape index: {2}]  }
   0x1   :  { %s960_s23 = smov 0  }
   0x2 LB: > { %s26_s24 = sadd.s32 1, %s896_s22  ;;  %p810_p0 = scmp.ge.s32.totalorder %s900_s23, 1  ;;  %s900_s23 = sphi %s960_s23, %s17_s23   ;;  %s896_s22 = sphi %s958_s22, %s1130_s22   ;;  %s892_s21 = sphi %s956_s21, %s1129_s21  }
   0x3   : > { %p27_p1 = scmp.ge.s32.totalorder %s26_s24, 2  ;;  %p255_p2 = scmp.lt.s32.totalorder %s900_s23, 3 }
   0x5   : > { %s1132_s24 = smov (%p27_p1, %s26_s24), 0  ;;  %p256_p3 = pnand %p810_p0, %p255_p2 }
   0x6   : > { %v344_v0 = vld [vmem:[%s1123_s1] sm:$0xf] (!%p256_p3)  ;;  %v902_v1 = vmov (!%p256_p3), 2   ;;  %v903_v2 = vmov (!%p256_p3), 0   ;;  %p309_p4 = scmp.lt.s32.totalorder (!%p256_p3), %s892_s21, 1  ;;  %v904_v3 = vmov (!%p256_p3), 4   ;;  %v356_v21 = vlaneseq (!%p256_p3) }
   0x7   : > { %259 = sbr.rel (%p256_p3) target bundleno = 356 (0x164), region = 36  ;;  %869 = vset.pattern.permute.xlu1 (!%p256_p3), %v902_v1  ;;  %867 = vset.pattern.permute.xlu0 (!%p256_p3), %v903_v2  ;;  %v905_v4 = vmov (!%p256_p3), 1   ;;  %s906_s8 = smov (!%p256_p3), 17   ;;  %v907_v7 = vmov (!%p256_p3), 3   ;;  %v908_v8 = vmov (!%p256_p3), 5   ;;  %v912_v9 = vmov (!%p256_p3), 6  }
   0x8   : > { %423 = vperm.xlu1 (!%p256_p3), %869, %v344_v0   ;;  %373 = vperm.xlu0 (!%p256_p3), %867, %v344_v0   ;;  %s909_s9 = smov (!%p256_p3), 16   ;;  %s910_s10 = smov (!%p256_p3), 15   ;;  %v914_v10 = vmov (!%p256_p3), 8   ;;  %v916_v11 = vmov (!%p256_p3), 7   ;;  %v585_v12 = vld [vmem:[%s1124_s2] sm:$0xf] (!%p256_p3) }
   0x9   : > { %s911_s11 = smov (!%p256_p3), 1   ;;  %s913_s12 = smov (!%p256_p3), 127   ;;  %v1012_v24 = vshrl.u32 (!%p256_p3), %v356_v21, 7  ;;  %v919_v27 = vmov (!%p256_p3), 839922192   ;;  %v1018_v29 = vld [vmem:[%s1125_s3] sm:$0xff] (!%p256_p3) }
   0xa   : > { %s915_s13 = smov (!%p256_p3), 113   ;;  %s917_s14 = smov (!%p256_p3), 111   ;;  %v472_v28 = vunpack.c.l.s4 (!%p256_p3), %v919_v27  ;;  %v1020_v30 = vand.u32 (!%p256_p3), 127, %v356_v21  ;;  %v1026_v34 = vld [vmem:[%s1125_s3 + $0x8] sm:$0xff] (!%p256_p3) }
   0xb   : > { %s918_s17 = smov (!%p256_p3), 112   ;;  %v457_v26 = vsub.s32 (!%p256_p3), 4, %v1012_v24  ;;  %v389_v31 = vsub.s32 (!%p256_p3), 1, %v1012_v24  ;;  %v363_v35 = vsub.s32 (!%p256_p3), 0, %v1012_v24  ;;  %v414_v36 = vsub.s32 (!%p256_p3), 2, %v1012_v24  ;;  %p817_p5 = scmp.ne.s32.totalorder (!%p256_p3), %s892_s21, 0 }
   0xc   : > { %870 = vset.pattern.permute.xlu1 (!%p256_p3), %v904_v3  ;;  %868 = vset.pattern.permute.xlu0 (!%p256_p3), %v905_v4  ;;  %vm384_vm0 = vcmp.lt.s32.totalorder (!%p256_p3), %v1020_v30, 16  ;;  %v473_v38 = vunpack.c.0.s8 (!%p256_p3), %v472_v28  ;;  %vm358_vm1 = vcmp.lt.s32.totalorder (!%p256_p3), %v1020_v30, 17  ;;  %vm409_vm2 = vcmp.lt.s32.totalorder (!%p256_p3), %v1020_v30, 15 }
   0xd   : > { %469 = vperm.xlu1 (!%p256_p3), %870, %v344_v0   ;;  %398 = vperm.xlu0 (!%p256_p3), %868, %v344_v0   ;;  %v458_v37 = vrot.slane (!%p256_p3), %v1018_v29, %v457_v26  ;;  %v462_v39 = vrot.slane (!%p256_p3), %v1026_v34, %v457_v26  ;;  %v390_v40 = vrot.slane (!%p256_p3), %v1018_v29, %v389_v31  ;;  %v439_v45 = vsub.s32 (!%p256_p3), 3, %v1012_v24 }
   0xe   : > { %s981_s27 = scalar_select %p309_p4, %s892_s21, 1  ;;  %v394_v41 = vrot.slane %v1026_v34, %v389_v31  ;;  %v364_v46 = vrot.slane %v1018_v29, %v363_v35  ;;  %v368_v47 = vrot.slane %v1026_v34, %v363_v35  ;;  %v415_v48 = vrot.slane %v1018_v29, %v414_v36 }
   0xf   : > { %v419_v52 = vrot.slane %v1026_v34, %v414_v36  ;;  %vm434_vm3 = vcmp.lt.s32.totalorder %v1020_v30, 1  ;;  %v465_v58 = vcombine.low %v458_v37, %v462_v39  ;;  %v476_v59 = vsub.s32 %v473_v38, %v1012_v24 }
  0x10   : > { %s822_s28 = sshll.u32 %s981_s27, 3  ;;  %v440_v60 = vrot.slane %v1018_v29, %v439_v45  ;;  %v444_v61 = vrot.slane %v1026_v34, %v439_v45  ;;  %v494_v4 = vsub.s32 5, %v1012_v24  ;;  %vm489_vm4 = vcmp.lt.s32.totalorder %v1020_v30, 127 }
  0x11   : > { %s317_s7 = scalar_lea.vmem %s1122_s0, %s822_s28  ;;  %871 = vset.pattern.permute.xlu1 %v907_v7  ;;  %872 = vset.pattern.permute.xlu0 %v908_v8  ;;  %vm514_vm5 = vcmp.lt.s32.totalorder %v1020_v30, 113  ;;  %v544_v36 = vsub.s32 7, %v1012_v24  ;;  %vm539_vm6 = vcmp.lt.s32.totalorder %v1020_v30, 112  ;;  %vm564_vm7 = vcmp.lt.s32.totalorder %v1020_v30, 111 }
  0x12   : > { %v989_v5 = vld [vmem:[%s317_s7] sm:$0xff]  ;;  %v499_v26 = vrot.slane %v1026_v34, %v494_v4  ;;  %vm602_vm8 = vcmask (!%p817_p5), 3072  }
  0x13   : > { %v350_v6 = vcombine.high %v989_v5, %v989_v5  ;;  %352 = vrot.lane.b32.xlu1 %v989_v5, %s906_s8 }
  0x15   : > { %354 = vrot.lane.b32.xlu0 %v350_v6, %s906_s8 }
  0x17   : > { %380 = vrot.lane.b32.xlu1 %v989_v5, %s909_s9 }
  0x19   : > { %382 = vrot.lane.b32.xlu0 %v350_v6, %s909_s9 }
  0x1b   : > { %448 = vperm.xlu1 %871, %v344_v0  }
  0x1d   : > { %405 = vrot.lane.b32.xlu0 %v989_v5, %s910_s10 }
  0x1f   : > { %407 = vrot.lane.b32.xlu1 %v350_v6, %s910_s10  ;;  %s334_s10 = scalar_lea.vmem %s1126_s4, %s822_s28 }
  0x20   : > { %873 = vset.pattern.permute.xlu1 %v912_v9 }
  0x21   : > { %430 = vrot.lane.b32.xlu0 %v989_v5, %s911_s11 }
  0x23   : > { %432 = vrot.lane.b32.xlu1 %v350_v6, %s911_s11 }
  0x25   : > { %503 = vperm.xlu0 %872, %v344_v0  }
  0x27   : > { %528 = vperm.xlu1 %873, %v344_v0  }
  0x29   : > { %487 = vrot.lane.b32.xlu0 %v350_v6, %s913_s12 }
  0x2a   : > { %875 = vset.pattern.permute.xlu0 %v914_v10  ;;  %v467_v10 = vmul.f32 %v465_v58, %v989_v5 }
  0x2b   : > { %485 = vrot.lane.b32.xlu1 %v989_v5, %s913_s12 }
  0x2c   : > { %874 = vset.pattern.permute.xlu1 %v916_v11 }
  0x2d   : > { %510 = vrot.lane.b32.xlu0 %v989_v5, %s915_s13 }
  0x2f   : > { %553 = vperm.xlu1 %874, %v344_v0  }
  0x31   : > { %578 = vperm.xlu0 %875, %v344_v0  }
  0x33   : > { %512 = vrot.lane.b32.xlu1 %v350_v6, %s915_s13 }
  0x35   : > { %560 = vrot.lane.b32.xlu0 %v989_v5, %s917_s14 }
  0x36   : > { %876 = vset.pattern.permute.xlu0 %v903_v2 }
  0x37   : > { %535 = vrot.lane.b32.xlu1 %v989_v5, %s918_s17 }
  0x39   : > { %588 = vperm.xlu0 %876, %v585_v12  }
  0x3b   : > { %537 = vrot.lane.b32.xlu1 %v350_v6, %s918_s17 }
  0x3f   : > { %562 = vrot.lane.b32.xlu1 %v350_v6, %s917_s14 }
  0x87   : > { %v1004_v13 = vpop.permute.xlu1 %423  ;;  %v1006_v14 = vpop.permute.xlu0 %373 }
  0x8c   : > { %v1008_v15 = vpop.permute.xlu1 %469  ;;  %v399_v16 = vpop.permute.xlu0 %398 }
  0x90   : > { %v353_v17 = vpop.permute.xlu1 %352  ;;  %v355_v18 = vpop.permute.xlu0 %354 }
  0x91   : > { %v359_v50 = vsel %vm358_vm1, %v353_v17, %v355_v18  ;;  %v360_v51 = vsel %vm358_vm1, %v355_v18, %v353_v17  ;;  %v477_v17 = vrot.slane %v1008_v15, %v476_v59 }
  0x92   : > { %v369_v62 = vmul.f32 %v364_v46, %v360_v51  ;;  %v370_v63 = vmul.f32 %v368_v47, %v359_v50  ;;  %v545_v50 = vrot.slane %v1018_v29, %v544_v36  ;;  %v549_v51 = vrot.slane %v1026_v34, %v544_v36 }
  0x94   : > { %v381_v19 = vpop.permute.xlu1 %380  ;;  %v383_v20 = vpop.permute.xlu0 %382  ;;  %v376_v18 = vmul.f32 %v1006_v14, %v369_v62 }
  0x95   : > { %v385_v43 = vsel %vm384_vm0, %v381_v19, %v383_v20  ;;  %v386_v44 = vsel %vm384_vm0, %v383_v20, %v381_v19  ;;  %v377_v19 = vmul.f32 %v1006_v14, %v370_v63  ;;  %v519_v20 = vsub.s32 6, %v1012_v24 }
  0x96   : > { %v395_v53 = vmul.f32 %v390_v40, %v386_v44  ;;  %v396_v54 = vmul.f32 %v394_v41, %v385_v43 }
  0x97   : > { %v524_v35 = vrot.slane %v1026_v34, %v519_v20  ;;  %v815_v34 = vld [vmem:[%s1125_s3 + $0x10] ss:$0 sm:$0xff] }
  0x98   : > { %v406_v23 = vpop.permute.xlu0 %405  ;;  %v401_v6 = vmul.f32 %v399_v16, %v395_v53  ;;  %v402_v7 = vmul.f32 %v399_v16, %v396_v54 }
  0x9a   : > { %v1010_v22 = vpop.permute.xlu1 %448  ;;  %v404_v5 = vadd.f32 %v402_v7, %v377_v19 }
  0x9c   : > { %v431_v32 = vpop.permute.xlu0 %430 }
  0x9e   : > { %v408_v25 = vpop.permute.xlu1 %407 }
  0x9f   : > { %v410_v55 = vsel %vm409_vm2, %v406_v23, %v408_v25  ;;  %v411_v56 = vsel %vm409_vm2, %v408_v25, %v406_v23  ;;  %v495_v23 = vrot.slane %v1018_v29, %v494_v4  ;;  %v403_v25 = vadd.f32 %v401_v6, %v376_v18 }
  0xa0   : > { %v420_v2 = vmul.f32 %v415_v48, %v411_v56  ;;  %v421_v3 = vmul.f32 %v419_v52, %v410_v55 }
  0xa2   : > { %v433_v33 = vpop.permute.xlu1 %432  ;;  %v426_v21 = vmul.f32 %v1004_v13, %v420_v2  ;;  %v427_v16 = vmul.f32 %v1004_v13, %v421_v3  ;;  %v479_v13 = vmul.f32 %v477_v17, %v467_v10 }
  0xa3   : > { %v435_v0 = vsel %vm434_vm3, %v431_v32, %v433_v33  ;;  %v436_v1 = vsel %vm434_vm3, %v433_v33, %v431_v32  ;;  %v520_v33 = vrot.slane %v1018_v29, %v519_v20 }
  0xa4   : > { %v1043_v49 = vpop.permute.xlu0 %503  ;;  %v445_v11 = vmul.f32 %v440_v60, %v436_v1  ;;  %v446_v12 = vmul.f32 %v444_v61, %v435_v0  ;;  %v428_v37 = vadd.f32 %v426_v21, %v403_v25  ;;  %v429_v38 = vadd.f32 %v427_v16, %v404_v5 }
  0xa5   : > { %v481_v52 = vcombine.high %v479_v13, %v479_v13 }
  0xa6   : > { %v1036_v42 = vpop.permute.xlu1 %528  ;;  %v451_v15 = vmul.f32 %v1010_v22, %v445_v11  ;;  %v452_v28 = vmul.f32 %v1010_v22, %v446_v12 }
  0xa8   : > { %v488_v8 = vpop.permute.xlu0 %487  ;;  %v453_v44 = vadd.f32 %v451_v15, %v428_v37  ;;  %v454_v45 = vadd.f32 %v452_v28, %v429_v38 }
  0xaa   : > { %v486_v57 = vpop.permute.xlu1 %485  ;;  %v483_v55 = vadd.f32 %v479_v13, %v453_v44  ;;  %v484_v56 = vadd.f32 %v481_v52, %v454_v45 }
  0xab   : > { %v490_v14 = vsel %vm489_vm4, %v486_v57, %v488_v8  ;;  %v491_v31 = vsel %vm489_vm4, %v488_v8, %v486_v57 }
  0xac   : > { %v511_v32 = vpop.permute.xlu0 %510  ;;  %v500_v41 = vmul.f32 %v495_v23, %v490_v14  ;;  %v501_v22 = vmul.f32 %v499_v26, %v491_v31  ;;  %v920_v23 = vmov (!%p817_p5), 0.0  }
  0xad   : > { %603 = vst.msk [vmem:[%s1127_s5] sm:$0xf] (!%p817_p5), %vm602_vm8, %v920_v23  ;;  %604 = vst.msk [vmem:[%s1128_s6] sm:$0xf] (!%p817_p5), %vm602_vm8, %v920_v23 }
  0xae   : > { %v554_v9 = vpop.permute.xlu1 %553  ;;  %v506_v24 = vmul.f32 %v1043_v49, %v500_v41  ;;  %v507_v53 = vmul.f32 %v1043_v49, %v501_v22  ;;  %v816_v49 = vld [vmem:[%s1125_s3 + $0x18] ss:$0 sm:$0xff] }
  0xb0   : > { %v579_v46 = vpop.permute.xlu0 %578  ;;  %v508_v62 = vadd.f32 %v506_v24, %v483_v55  ;;  %v509_v63 = vadd.f32 %v507_v53, %v484_v56 }
  0xb2   : > { %v513_v27 = vpop.permute.xlu1 %512 }
  0xb3   : > { %v515_v39 = vsel %vm514_vm5, %v511_v32, %v513_v27  ;;  %v516_v40 = vsel %vm514_vm5, %v513_v27, %v511_v32 }
  0xb4   : > { %v525_v47 = vmul.f32 %v520_v33, %v515_v39  ;;  %v526_v48 = vmul.f32 %v524_v35, %v516_v40  ;;  %v561_v0 = vpop.permute.xlu0 %560 }
  0xb6   : > { %v536_v43 = vpop.permute.xlu1 %535  ;;  %v531_v59 = vmul.f32 %v1036_v42, %v525_v47  ;;  %v532_v60 = vmul.f32 %v1036_v42, %v526_v48 }
  0xb8   : > { %v533_v8 = vadd.f32 %v531_v59, %v508_v62  ;;  %v534_v10 = vadd.f32 %v532_v60, %v509_v63  ;;  %v589_v19 = vpop.permute.xlu0 %588 }
  0xba   : > { %v538_v54 = vpop.permute.xlu1 %537 }
  0xbb   : > { %v540_v57 = vsel %vm539_vm6, %v536_v43, %v538_v54  ;;  %v541_v58 = vsel %vm539_vm6, %v538_v54, %v536_v43 }
  0xbc   : > { %v550_v61 = vmul.f32 %v545_v50, %v540_v57  ;;  %v551_v29 = vmul.f32 %v549_v51, %v541_v58 }
  0xbe   : > { %v556_v1 = vmul.f32 %v554_v9, %v550_v61  ;;  %v557_v2 = vmul.f32 %v554_v9, %v551_v29  ;;  %v563_v3 = vpop.permute.xlu1 %562 }
  0xbf   : > { %v565_v42 = vsel %vm564_vm7, %v561_v0, %v563_v3  ;;  %v566_v4 = vsel %vm564_vm7, %v563_v3, %v561_v0 }
  0xc0   : > { %v575_v6 = vmul.f32 %v815_v34, %v565_v42  ;;  %v576_v7 = vmul.f32 %v816_v49, %v566_v4  ;;  %v558_v11 = vadd.f32 %v556_v1, %v533_v8  ;;  %v559_v12 = vadd.f32 %v557_v2, %v534_v10 }
  0xc2   : > { %v581_v17 = vmul.f32 %v579_v46, %v575_v6  ;;  %v582_v18 = vmul.f32 %v579_v46, %v576_v7 }
  0xc4   : > { %v583_v20 = vadd.f32 %v581_v17, %v558_v11  ;;  %v584_v21 = vadd.f32 %v582_v18, %v559_v12  ;;  %601 = sbr.rel (%p817_p5) target bundleno = 203 (0xcb), region = 40 }
  0xc6   : > { %v591_v9 = vadd.f32 %v589_v19, %v583_v20  ;;  %v592_v16 = vadd.f32 %v589_v19, %v584_v21 }
  0xc8   : > { %v595_v30 = vcombine.low %v591_v9, %v592_v16 }
  0xca   : > { %597 = vst [vmem:[%s334_s10] sm:$0xff] %v595_v30 }
  0xcb PF: > { %vm606_vm9 = vcmask 1043456   ;;  %v616_v25 = vmul.f32 %v591_v9, %v591_v9  ;;  %v617_v5 = vmul.f32 %v592_v16, %v592_v16  ;;  %v605_v13 = vld [vmem:[%s1127_s5] sm:$0xf]  ;;  %vm613_vm10 = vcmask 3072  }
  0xcc   : > { %v607_v26 = vsel %vm606_vm9, %v591_v9, 0.0  ;;  %v608_v27 = vsel %vm606_vm9, %v592_v16, 0.0  ;;  %v615_v35 = vld [vmem:[%s1128_s6] sm:$0xf] }
  0xcd   : > { %v609_v15 = vadd.f32 %v608_v27, %v607_v26  ;;  %v618_v28 = vsel %vm606_vm9, %v616_v25, 0.0  ;;  %v619_v14 = vsel %vm606_vm9, %v617_v5, 0.0 }
  0xce   : > { %v620_v31 = vadd.f32 %v619_v14, %v618_v28 }
  0xcf   : > { %610 = vadd.xlane.f32.xlu0 %v609_v15 }
  0xd3   : > { %621 = vadd.xlane.f32.xlu0 %v620_v31 }
 0x15c   : > { %v611_v32 = vpop.xlane.xlu0 %610 }
 0x15d   : > { %v612_v33 = vadd.f32 %v611_v32, %v605_v13 }
 0x15f   : > { %614 = vst.msk [vmem:[%s1127_s5] sm:$0xf] %vm613_vm10, %v612_v33 }
 0x160   : > { %v622_v36 = vpop.xlane.xlu0 %621 }
 0x161   : > { %v623_v37 = vadd.f32 %v622_v36, %v615_v35 }
 0x163   : > { %624 = vst.msk [vmem:[%s1128_s6] sm:$0xf] %vm613_vm10, %v623_v37 }
 0x164 PF: > { %s17_s23 = sadd.s32 1, %s900_s23   ;;  %s1129_s21 = smov %s896_s22 }
 0x165   : > { %p14_p6 = scmp.ge.s32.totalorder %s17_s23, 4   ;;  %s1130_s22 = smov %s1132_s24 }
 0x167   :  { %16 = sbr.rel (!%p14_p6) target bundleno = 2 (0x2), region = 100 }

</bundles_post_ra>
